<compile_context>
chip_gen: v6e
topology: v6e:2x2x1
jax: 0.10.0
libtpu: 0.0.40
codegen_flags: <defaults>
</compile_context>

<pallas_src>
import math

import jax
import jax.numpy as jnp
from jax import lax
from jax.experimental import pallas as pl
from jax.experimental.pallas import tpu as pltpu


def _round_up(x, m):
    return ((x + m - 1) // m) * m


def _cdiv(a, b):
    return (a + b - 1) // b


def _vmem_capacity_bytes():
    try:
        return int(pltpu.get_tpu_info().vmem_capacity_bytes)
    except Exception:
        return 64 * 1024 * 1024  # conservative fallback (v7x per-TensorCore)


# -----------------------------------------------------------------------------
# Kernels
# -----------------------------------------------------------------------------
def _make_kernel(num_k, tk, w_resident, use_scratch):
    """Returns (kernel, needs_scratch)."""

    def _contract(x_ref, w_ref, k):
        if w_resident:
            off = pl.multiple_of(k * tk, tk)
            w = w_ref[:, pl.ds(off, tk)]
        else:
            w = w_ref[...]
        # y_tile = x_tile @ W_tile^T (contract last dims -> MXU handles trans_b)
        return lax.dot_general(
            x_ref[...], w,
            dimension_numbers=(((1,), (1,)), ((), ())),
            preferred_element_type=jnp.float32,
        )

    if num_k == 1:
        # Single K step: no scratch, no pl.when.
        def kernel(x_ref, w_ref, b_ref, o_ref):
            o_ref[...] = (b_ref[...] + _contract(x_ref, w_ref, 0)).astype(o_ref.dtype)

        return kernel, False

    if not use_scratch:
        # f32 output: accumulate directly into the revisit-resident output block.
        def kernel(x_ref, w_ref, b_ref, o_ref):
            k = pl.program_id(1)

            @pl.when(k == 0)
            def _():
                o_ref[...] = jnp.broadcast_to(b_ref[...], o_ref.shape)

            o_ref[...] += _contract(x_ref, w_ref, k)

        return kernel, False

    # Non-f32 output with K tiling: f32 scratch accumulator.
    def kernel(x_ref, w_ref, b_ref, o_ref, acc_ref):
        k = pl.program_id(1)

        @pl.when(k == 0)
        def _():
            acc_ref[...] = jnp.broadcast_to(b_ref[...], acc_ref.shape)

        acc_ref[...] += _contract(x_ref, w_ref, k)

        @pl.when(k == pl.num_programs(1) - 1)
        def _():
            o_ref[...] = acc_ref[...].astype(o_ref.dtype)

    return kernel, True


# -----------------------------------------------------------------------------
# Parameter preparation (hoisted off the per-call path)
# -----------------------------------------------------------------------------
def prepare_logreg_params(weight, bias, *, x_dtype=None, tk_max=2048):
    """One-time cast + pad of nn.Linear params (amortized across forwards)."""
    nb_classes, ft_in = weight.shape
    x_dtype = jnp.dtype(x_dtype if x_dtype is not None else weight.dtype)

    c_pad = _round_up(max(nb_classes, 1), 128)  # lane-dense class axis
    if ft_in <= tk_max:
        tk, k_pad = ft_in, ft_in
    else:
        tk = tk_max
        k_pad = _round_up(ft_in, tk)

    # NOTE: deliberate numerics choice — W is cast to the activation dtype for
    # the MXU; accumulation stays f32.
    w = weight.astype(x_dtype)
    if (c_pad, k_pad) != (nb_classes, ft_in):
        w = jnp.pad(w, ((0, c_pad - nb_classes), (0, k_pad - ft_in)))
    b = jnp.pad(bias.astype(jnp.float32), (0, c_pad - nb_classes)).reshape(1, c_pad)

    return {
        "w": w, "b": b,
        "nb_classes": int(nb_classes), "ft_in": int(ft_in),
        "c_pad": int(c_pad), "tk": int(tk), "k_pad": int(k_pad),
        "num_k": int(k_pad // tk),
    }


# -----------------------------------------------------------------------------
# Forward
# -----------------------------------------------------------------------------
def logreg_apply(params, seq, *, tm_max=None, slice_output=True):
    """seq: [N, ft_in] -> [N, nb_classes] using prepared params."""
    n, ft_in = seq.shape
    if ft_in != params["ft_in"]:
        raise ValueError(f"ft_in mismatch: {ft_in} vs {params['ft_in']}")

    dtype = seq.dtype
    itm = jnp.dtype(dtype).itemsize
    c_pad, tk = params["c_pad"], params["tk"]
    k_pad, num_k = params["k_pad"], params["num_k"]
    nb_classes = params["nb_classes"]

    # ---- generation-aware budgets --------------------------------------------
    vmem_cap = _vmem_capacity_bytes()
    budget = (vmem_cap * 3) // 4  # ~48 MiB on v7x, ~96 MiB on v5e/v6e
    if tm_max is None:
        tm_max = 2048 if vmem_cap >= 100 * 1024 * 1024 else 1024

    # ---- row tiling: no row padding of x; boundary block is ragged -----------
    align = max(8, 32 // itm)          # 8 (f32) / 16 (bf16) / 32 (int8)
    n_al = _round_up(max(n, 1), align)
    tm = _round_up(min(tm_max, n_al), align)
    # keep >= 2 row blocks for non-tiny batches (megacore sharding on v7x)
    if n_al >= 256 and _cdiv(n_al, tm) < 2:
        tm = max(align, _round_up(_cdiv(n_al, 2), align))

    use_scratch = (num_k > 1) and (dtype != jnp.float32)
    w_resident = (num_k > 1) and (c_pad * k_pad * itm <= budget // 3)

    def _vmem_est(tm_):
        w_bytes = c_pad * k_pad * itm if w_resident else 2 * c_pad * tk * itm
        e = (2 * tm_ * tk * itm        # x double buffer
             + w_bytes                 # weights (single- or double-buffered)
             + 2 * tm_ * c_pad * itm   # output double buffer
             + 2 * c_pad * 4)          # bias
        if use_scratch:
            e += tm_ * c_pad * 4
        return e

    while _vmem_est(tm) > budget and tm > align:
        tm = max(align, _round_up(tm // 2, align))

    num_row = _cdiv(n_al, tm)
    n_out = n_al

    # ---- zero-pad only the K axis (required when K is tiled) -----------------
    x = seq
    if k_pad != ft_in:
        x = jnp.pad(seq, ((0, 0), (0, k_pad - ft_in)))

    kernel, needs_scratch = _make_kernel(num_k, tk, w_resident, use_scratch)

    if w_resident:
        w_spec = pl.BlockSpec((c_pad, k_pad), lambda i, k: (0, 0),
                              pipeline_mode=pl.Buffered(1))
    else:
        w_spec = pl.BlockSpec((c_pad, tk), lambda i, k: (0, k))

    scratch_shapes = [pltpu.VMEM((tm, c_pad), jnp.float32)] if needs_scratch else []

    vmem_limit = int(min(budget, max(int(1.25 * _vmem_est(tm)), 32 * 1024 * 1024)))

    cost = pl.CostEstimate(
        flops=2 * n_out * k_pad * c_pad,
        transcendentals=0,
        bytes_accessed=(n * k_pad + c_pad * k_pad + n_out * c_pad) * itm + c_pad * 4,
    )

    out = pl.pallas_call(
        kernel,
        out_shape=jax.ShapeDtypeStruct((n_out, c_pad), dtype),
        grid_spec=pltpu.PrefetchScalarGridSpec(
            num_scalar_prefetch=0,
            grid=(num_row, num_k),
            in_specs=[
                pl.BlockSpec((tm, tk), lambda i, k: (i, k)),    # x: streamed
                w_spec,                                         # W
                pl.BlockSpec((1, c_pad), lambda i, k: (0, 0)),  # bias: resident
            ],
            out_specs=pl.BlockSpec((tm, c_pad), lambda i, k: (i, 0)),
            scratch_shapes=scratch_shapes,
        ),
        compiler_params=pltpu.CompilerParams(
            dimension_semantics=("parallel", "arbitrary"),
            vmem_limit_bytes=vmem_limit,
        ),
        cost_estimate=cost,
    )(x, params["w"], params["b"])

    if slice_output:
        # Callers inside a jit can pass slice_output=False and fuse this slice
        # (or the downstream softmax / argmax / loss) themselves.
        out = out[:n, :nb_classes]
    return out


def logreg_forward(seq, weight, bias, **kwargs):
    """Drop-in y = seq @ W^T + b.  For repeated calls, prepare params once."""
    params = prepare_logreg_params(weight, bias, x_dtype=seq.dtype)
    return logreg_apply(params, seq, **kwargs)


def init_logreg_params(key, ft_in, nb_classes):
    # xavier_uniform_ on weight of shape (nb_classes, ft_in); bias = 0
    bound = math.sqrt(6.0 / (ft_in + nb_classes))
    weight = jax.random.uniform(
        key, (nb_classes, ft_in), dtype=jnp.float32, minval=-bound, maxval=bound
    )
    bias = jnp.zeros((nb_classes,), dtype=jnp.float32)
    return weight, bias


if __name__ == "__main__":
    key = jax.random.PRNGKey(0)
    k_x, k_w = jax.random.split(key)

    N, FT_IN, NB_CLASSES = 8, 32, 8
    seq = jax.random.normal(k_x, (N, FT_IN), dtype=jnp.float32)
    weight, bias = init_logreg_params(k_w, FT_IN, NB_CLASSES)

    # Hoisted one-time parameter prep, then the streaming forward.
    params = prepare_logreg_params(weight, bias, x_dtype=seq.dtype)
    out = logreg_apply(params, seq)
    jax.block_until_ready(out)

    # sanity check against plain-JAX reference
    ref = seq @ weight.T + bias
    assert out.shape == (N, NB_CLASSES)
    assert jnp.allclose(out, ref, atol=1e-5, rtol=1e-5)

    print("KERNEL_OK")
</pallas_src>

<mosaic_0001>
module attributes {stable_mosaic.version = 11 : i64} {
  func.func @kernel(%arg0: i32, %arg1: i32, %arg2: memref<8x32xf32, #tpu.memory_space<vmem>>, %arg3: memref<128x32xf32, #tpu.memory_space<vmem>>, %arg4: memref<1x128xf32, #tpu.memory_space<vmem>>, %arg5: memref<8x128xf32, #tpu.memory_space<vmem>>) attributes {dimension_semantics = [#tpu.dimension_semantics<parallel>, #tpu.dimension_semantics<arbitrary>], iteration_bounds = array<i64: 1, 1>, scalar_prefetch = 0 : i64, scratch_operands = 0 : i64, tpu.core_type = #tpu.core_type<tc>, window_params = [{transform_indices = @transform_0, window_bounds = array<i64: 8, 32>}, {transform_indices = @transform_1, window_bounds = array<i64: 128, 32>}, {pipeline_mode = #tpu.pipeline_mode<synchronous>, transform_indices = @transform_2, window_bounds = array<i64: 1, 128>}, {transform_indices = @transform_3, window_bounds = array<i64: 8, 128>}]} {
    %c0 = arith.constant 0 : index
    %c0_0 = arith.constant 0 : index
    %0 = vector.load %arg4[%c0, %c0_0] : memref<1x128xf32, #tpu.memory_space<vmem>>, vector<1x128xf32>
    %c0_1 = arith.constant 0 : index
    %c0_2 = arith.constant 0 : index
    %1 = vector.load %arg3[%c0_1, %c0_2] : memref<128x32xf32, #tpu.memory_space<vmem>>, vector<128x32xf32>
    %c0_3 = arith.constant 0 : index
    %c0_4 = arith.constant 0 : index
    %2 = vector.load %arg2[%c0_3, %c0_4] : memref<8x32xf32, #tpu.memory_space<vmem>>, vector<8x32xf32>
    %cst = arith.constant dense<0.000000e+00> : vector<8x128xf32>
    %3 = tpu.matmul %2, %1, %cst {dimension_numbers = #tpu.dot_dimension_numbers<[1], [1], [0], [0], [0, 0, 1, 0], [], []>} : vector<8x32xf32>, vector<128x32xf32>, vector<8x128xf32> -> vector<8x128xf32>
    %4 = vector.broadcast %0 : vector<1x128xf32> to vector<8x128xf32>
    %5 = arith.addf %4, %3 : vector<8x128xf32>
    %c0_5 = arith.constant 0 : index
    %c0_6 = arith.constant 0 : index
    %6 = vector.load %arg5[%c0_5, %c0_6] : memref<8x128xf32, #tpu.memory_space<vmem>>, vector<8x128xf32>
    tpu.vector_store %arg5[%c0_5, %c0_6], %5 {strides = array<i32>} : memref<8x128xf32, #tpu.memory_space<vmem>>, vector<8x128xf32>,
    return
  }
  func.func @transform_0(%arg0: i32, %arg1: i32) -> (i32, i32) {
    %c0_i32 = arith.constant 0 : i32
    return %arg0, %arg1 : i32, i32
  }
  func.func @transform_1(%arg0: i32, %arg1: i32) -> (i32, i32) {
    %c0_i32 = arith.constant 0 : i32
    %c0_i32_0 = arith.constant 0 : i32
    return %c0_i32, %arg1 : i32, i32
  }
  func.func @transform_2(%arg0: i32, %arg1: i32) -> (i32, i32) {
    %c0_i32 = arith.constant 0 : i32
    %c0_i32_0 = arith.constant 0 : i32
    %c0_i32_1 = arith.constant 0 : i32
    return %c0_i32, %c0_i32_0 : i32, i32
  }
  func.func @transform_3(%arg0: i32, %arg1: i32) -> (i32, i32) {
    %c0_i32 = arith.constant 0 : i32
    %c0_i32_0 = arith.constant 0 : i32
    return %arg0, %c0_i32 : i32, i32
  }
}

</mosaic_0001>

<bundles_post_ra>
// kernel: tpu_custom_call.1
= control target key start
LH: loop header
LB: loop body
LE: loop exit
PB: predicated region body
PF: predicated region fallthrough
CT: control target
= control target key end

     0   :  { %vm33_vm0 = vcmask 261120   ;;  %v272_v1 = vmov 0.0   ;;  %vm273_vm1 = vmmov 0   ;;  %s369_s0 = inlined_call_operand.vmem [shape: f32[8,32], index: 0, kind: input, shape index: {}]   ;;  %s370_s1 = inlined_call_operand.vmem [shape: f32[128,32], index: 1, kind: input, shape index: {}]   ;;  %s371_s2 = inlined_call_operand.vmem [shape: f32[1,128], index: 2, kind: input, shape index: {}]   ;;  %s372_s3 = inlined_call_operand.hbm [shape: f32[8,128], index: 3, kind: output, shape index: {}]  }
   0x1   :  { %v31_v0 = vld [vmem:[%s370_s1 + $0x78] sm:$0xff]  ;;  %212 = vmatprep.subr.mxu0 %v272_v1  ;;  %244 = vmatprep.mubr.msk.f32.mxu0 %vm273_vm1, %v272_v1  ;;  %v30_v2 = vld [vmem:[%s370_s1 + $0x70] sm:$0xff] }
   0x2   :  { %213 = vmatpush3.xpose.msk.msra.mxu0 %vm33_vm0, %v31_v0 }
   0x3   :  { %214 = vmatprep.subr.mxu0 %v272_v1 }
   0x6   :  { %215 = vmatpush3.xpose.msk.msra.mxu0 %vm33_vm0, %v30_v2 }
   0x7   :  { %8 = vsyncpa [#allocation3], 0  ;;  %216 = vmatprep.subr.mxu0 %v272_v1  ;;  %v29_v3 = vld [vmem:[%s370_s1 + $0x68] sm:$0xff]  ;;  %v28_v4 = vld [vmem:[%s370_s1 + $0x60] sm:$0xff]  ;;  %s274_s21 = smov [#allocation2]  }
   0x8   :  { %v27_v5 = vld [vmem:[%s370_s1 + $0x58] sm:$0xff]  ;;  %v26_v6 = vld [vmem:[%s370_s1 + $0x50] sm:$0xff]  ;;  %v25_v7 = vld [vmem:[%s370_s1 + $0x48] sm:$0xff]  ;;  %s169_s22 = sshll.u32 %s274_s21, 4  ;;  %s170_s22 = int_to_ptr.vmem [resolvable:$true] %s169_s22 }
   0x9   :  { %v24_v8 = vld [vmem:[%s370_s1 + $0x40] sm:$0xff]  ;;  %v23_v9 = vld [vmem:[%s370_s1 + $0x38] sm:$0xff]  ;;  %v22_v10 = vld [vmem:[%s370_s1 + $0x30] sm:$0xff]  ;;  %p255_p1 = scmp.lt.s32.totalorder %s170_s22, %s170_s22 }
   0xa   :  { %217 = vmatpush3.xpose.msk.msra.mxu0 %vm33_vm0, %v29_v3  ;;  %v21_v11 = vld [vmem:[%s370_s1 + $0x28] sm:$0xff]  ;;  %v20_v12 = vld [vmem:[%s370_s1 + $0x20] sm:$0xff]  ;;  %v19_v13 = vld [vmem:[%s370_s1 + $0x18] sm:$0xff] }
   0xb   :  { %218 = vmatprep.subr.mxu0 %v272_v1  ;;  %v18_v14 = vld [vmem:[%s370_s1 + $0x10] sm:$0xff]  ;;  %v17_v15 = vld [vmem:[%s370_s1 + $0x8] sm:$0xff]  ;;  %v16_v16 = vld [vmem:[%s370_s1] sm:$0xff]  ;;  %s250_s1 = scalar_lea.vmem %s170_s22, 128 }
   0xc   :  { %v32_v17 = vld [vmem:[%s369_s0] sm:$0xff]  ;;  %p251_p0 = scmp.ne.s32.totalorder %s170_s22, %s250_s1  ;;  %p256_p2 = scmp.lt.s32.totalorder %s250_s1, %s250_s1 }
   0xd   :  { %v194_v18 = vld [vmem:[%s371_s2] ss:$0 sm:$0xff] }
   0xe   :  { %219 = vmatpush3.xpose.msk.msra.mxu0 %vm33_vm0, %v28_v4  ;;  %p257_p3 = por %p256_p2, %p255_p1 }
   0xf   :  { %220 = vmatprep.subr.mxu0 %v272_v1 }
  0x10   :  { %p258_p4 = pnand %p257_p3, %p251_p0 }
  0x12   :  { %221 = vmatpush3.xpose.msk.msra.mxu0 %vm33_vm0, %v27_v5 }
  0x13   :  { %222 = vmatprep.subr.mxu0 %v272_v1 }
  0x16   :  { %223 = vmatpush3.xpose.msk.msra.mxu0 %vm33_vm0, %v26_v6 }
  0x17   :  { %224 = vmatprep.subr.mxu0 %v272_v1 }
  0x1a   :  { %225 = vmatpush3.xpose.msk.msra.mxu0 %vm33_vm0, %v25_v7 }
  0x1b   :  { %226 = vmatprep.subr.mxu0 %v272_v1 }
  0x1e   :  { %227 = vmatpush3.xpose.msk.msra.mxu0 %vm33_vm0, %v24_v8 }
  0x1f   :  { %228 = vmatprep.subr.mxu0 %v272_v1 }
  0x22   :  { %229 = vmatpush3.xpose.msk.msra.mxu0 %vm33_vm0, %v23_v9 }
  0x23   :  { %230 = vmatprep.subr.mxu0 %v272_v1 }
  0x26   :  { %231 = vmatpush3.xpose.msk.msra.mxu0 %vm33_vm0, %v22_v10 }
  0x27   :  { %232 = vmatprep.subr.mxu0 %v272_v1 }
  0x2a   :  { %233 = vmatpush3.xpose.msk.msra.mxu0 %vm33_vm0, %v21_v11 }
  0x2b   :  { %234 = vmatprep.subr.mxu0 %v272_v1 }
  0x2e   :  { %235 = vmatpush3.xpose.msk.msra.mxu0 %vm33_vm0, %v20_v12 }
  0x2f   :  { %236 = vmatprep.subr.mxu0 %v272_v1 }
  0x32   :  { %237 = vmatpush3.xpose.msk.msra.mxu0 %vm33_vm0, %v19_v13 }
  0x33   :  { %238 = vmatprep.subr.mxu0 %v272_v1 }
  0x36   :  { %239 = vmatpush3.xpose.msk.msra.mxu0 %vm33_vm0, %v18_v14 }
  0x37   :  { %240 = vmatprep.subr.mxu0 %v272_v1 }
  0x3a   :  { %241 = vmatpush3.xpose.msk.msra.mxu0 %vm33_vm0, %v17_v15 }
  0x3b   :  { %242 = vmatprep.subr.mxu0 %v272_v1 }
  0x3e   :  { %243 = vmatpush3.xpose.msk.msra.mxu0 %vm33_vm0, %v16_v16 }
  0x41   :  { %245 = vmatmul.mubr.msk.f32.vlgmr.msra.gmra.mxu0 %vm33_vm0, %v32_v17 }
 0x101   :  { %v151_v19 = vpop.f32.mrf.mxu0 }
 0x102   :  { %v161_v20 = vadd.f32 %v194_v18, %v151_v19 }
 0x103   :  { %v246_v21 = vpop.f32.mrf.mxu0 }
 0x104   :  { %162 = vst [vmem:[#allocation2] sm:$0xff] %v161_v20 }
 0x105   :  { %261 = shalt.err (!%p258_p4)
}
 0x106   :  { %172 = dma.vmem_to_hbm [thread:$0]  %s170_s22, 128, %s372_s3, [#allocation3]  }
 0x107   :  { %270 = dma.done.wait [#allocation3], 128  }
 0x108   :  { %271 = vsyncadd [#allocation3], 4294967168 }
 0x109   :  { %176 = vsyncpa [#allocation3], 1 }

</bundles_post_ra>
